<compile_context>
chip_gen: v7x
topology: tpu7x:2x2x1
jax: 0.10.0
libtpu: 0.0.40
codegen_flags: <defaults>
</compile_context>

<pallas_src>
import functools

import jax
import jax.numpy as jnp
from jax.experimental import pallas as pl
from jax.experimental.pallas import tpu as pltpu


# ----------------------------------------------------------------------------
# Pallas kernel
# ----------------------------------------------------------------------------
def _resblk_kernel(*refs, C_out, L_out, n_valid, Np, stride, has_extra):
    it = iter(refs)
    x1_ref = next(it)                               # (C_in, Np)        f32  centre tap
    xt_ref = next(it) if stride > 1 else None       # (2, C_in, Np)     bf16 taps k=0,2
    w1_ref = next(it)                               # (3, C_out, C_in)  bf16
    w2_ref = next(it)                               # (3, C_out, C_out) bf16
    we_ref = next(it) if has_extra else None        # (C_out, C_in)     bf16
    vec_ref = next(it)                              # (9, C_out, 1)     f32
    o_ref = next(it)                                # (C_out, Np)       f32

    f32 = jnp.float32
    bf16 = jnp.bfloat16
    eps = 1e-5
    inv_n = 1.0 / float(n_valid)

    # Column bookkeeping: which lane-columns hold real data and which in-batch
    # neighbours exist ("same" padding => zero taps at batch-element boundaries
    # and in the Np padding tail).
    col = jax.lax.broadcasted_iota(jnp.int32, (1, Np), 1)
    pos = col % L_out
    valid = col < n_valid
    valid_f = jnp.where(valid, 1.0, 0.0)                       # (1, Np) f32
    has_left = jnp.logical_and(valid, pos > 0)
    has_right = jnp.logical_and(valid, pos < (L_out - 1))

    def tap_left(y):     # out[:, j] = y[:, j-1]   (0 at batch starts / padding)
        return jnp.where(has_left, pltpu.roll(y, 1, 1), 0.0)

    def tap_right(y):    # out[:, j] = y[:, j+1]   (0 at batch ends / padding)
        return jnp.where(has_right, pltpu.roll(y, Np - 1, 1), 0.0)

    def bn(y, gamma, beta):
        # training-mode BatchNorm1d over (batch, length) == the valid lane columns;
        # centered (two-pass) variance for numerical stability, biased (divide by N).
        mean = jnp.sum(y * valid_f, axis=1, keepdims=True) * inv_n
        d = (y - mean) * valid_f
        var = jnp.sum(d * d, axis=1, keepdims=True) * inv_n
        return (y - mean) * (gamma * jax.lax.rsqrt(var + eps)) + beta

    x1 = x1_ref[...]                 # f32 (kept f32 so identity shortcut is exact)
    x1b = x1.astype(bf16)

    # ---- conv1 (k=3, pad=1, stride folded into the taps) ----
    if stride > 1:
        t0 = xt_ref[0]
        t2 = xt_ref[1]
    else:
        t0 = tap_left(x1).astype(bf16)
        t2 = tap_right(x1).astype(bf16)
    acc1 = (jnp.dot(w1_ref[0], t0, preferred_element_type=f32)
            + jnp.dot(w1_ref[1], x1b, preferred_element_type=f32)
            + jnp.dot(w1_ref[2], t2, preferred_element_type=f32)
            + vec_ref[0])

    # ---- bn1 + relu ----
    y1 = jnp.maximum(bn(acc1, vec_ref[1], vec_ref[2]), 0.0)

    # ---- conv2 (k=3, stride=1, pad=1) ----
    p0 = tap_left(y1).astype(bf16)
    p1 = y1.astype(bf16)
    p2 = tap_right(y1).astype(bf16)
    acc2 = (jnp.dot(w2_ref[0], p0, preferred_element_type=f32)
            + jnp.dot(w2_ref[1], p1, preferred_element_type=f32)
            + jnp.dot(w2_ref[2], p2, preferred_element_type=f32)
            + vec_ref[3])

    # ---- bn2 ----
    y2 = bn(acc2, vec_ref[4], vec_ref[5])

    # ---- shortcut ----
    if has_extra:
        accs = jnp.dot(we_ref[...], x1b, preferred_element_type=f32) + vec_ref[6]
        shortcut = bn(accs, vec_ref[7], vec_ref[8])
    else:
        shortcut = x1        # identity path (ch_in == ch_out, stride == 1)

    o_ref[...] = jnp.maximum(shortcut + y2, 0.0)


# ----------------------------------------------------------------------------
# Wrapper
# ----------------------------------------------------------------------------
def _full_spec(shape):
    n = len(shape)
    return pl.BlockSpec(shape, lambda i, _n=n: (0,) * _n)


def _to_lane_major(a3, Np):
    # (B, C, L) -> (C, B*L) zero-padded to Np lanes; column b*L + t == a3[b, :, t].
    B, C, L = a3.shape
    a2 = jnp.transpose(a3, (1, 0, 2)).reshape(C, B * L)
    return jnp.pad(a2, ((0, 0), (0, Np - B * L)))


def resblk_forward(x, params, *, stride=1):
    B, C_in, L = x.shape
    C_out = params["w1"].shape[0]
    has_extra = "we" in params
    if not has_extra and stride != 1:
        # matches the PyTorch module, whose identity shortcut would shape-mismatch
        raise ValueError("identity shortcut (ch_in == ch_out) requires stride == 1")

    L_out = (L + 2 - 3) // stride + 1
    n_valid = B * L_out
    Np = pl.cdiv(n_valid, 128) * 128          # lane-dense, multiple of 128

    x = x.astype(jnp.float32)

    # centre tap of conv1 (== x[:, :, ::stride]); also the shortcut input
    x1 = _to_lane_major(x[:, :, ::stride][:, :, :L_out], Np)

    inputs = [x1]
    in_specs = [_full_spec((C_in, Np))]

    if stride > 1:
        # strided off-centre taps cannot be expressed as an in-kernel roll
        x_pad = jnp.pad(x, ((0, 0), (0, 0), (1, 1)))
        taps = [_to_lane_major(x_pad[:, :, k::stride][:, :, :L_out], Np).astype(jnp.bfloat16)
                for k in (0, 2)]
        xt = jnp.stack(taps, axis=0)
        inputs.append(xt)
        in_specs.append(_full_spec((2, C_in, Np)))

    w1 = jnp.transpose(params["w1"], (2, 0, 1)).astype(jnp.bfloat16)   # (3, C_out, C_in)
    w2 = jnp.transpose(params["w2"], (2, 0, 1)).astype(jnp.bfloat16)   # (3, C_out, C_out)
    inputs += [w1, w2]
    in_specs += [_full_spec((3, C_out, C_in)), _full_spec((3, C_out, C_out))]

    if has_extra:
        we = params["we"][:, :, 0].astype(jnp.bfloat16)                # (C_out, C_in)
        inputs.append(we)
        in_specs.append(_full_spec((C_out, C_in)))
        be, ge, bte = params["be"], params["ge"], params["bte"]
    else:
        zeros = jnp.zeros((C_out,), jnp.float32)
        be = ge = bte = zeros

    # per-channel vectors packed as (9, C_out, 1): b1,g1,bt1, b2,g2,bt2, be,ge,bte
    vec = jnp.stack([params["b1"], params["g1"], params["bt1"],
                     params["b2"], params["g2"], params["bt2"],
                     be, ge, bte], axis=0)[:, :, None].astype(jnp.float32)
    inputs.append(vec)
    in_specs.append(_full_spec((9, C_out, 1)))

    kernel = functools.partial(_resblk_kernel, C_out=C_out, L_out=L_out,
                               n_valid=n_valid, Np=Np, stride=stride,
                               has_extra=has_extra)

    out2d = pl.pallas_call(
        kernel,
        out_shape=jax.ShapeDtypeStruct((C_out, Np), jnp.float32),
        grid=(1,),
        in_specs=in_specs,
        out_specs=_full_spec((C_out, Np)),
        compiler_params=pltpu.CompilerParams(
            dimension_semantics=("arbitrary",),
            vmem_limit_bytes=32 * 1024 * 1024),
    )(*inputs)

    # (C_out, B*L_out) -> (B, C_out, L_out)
    out = out2d[:, :n_valid].reshape(C_out, B, L_out)
    return jnp.transpose(out, (1, 0, 2))


# ----------------------------------------------------------------------------
# Parameter init (PyTorch-default-like) and a pure-JAX reference for checking
# ----------------------------------------------------------------------------
def init_resblk_params(key, ch_in, ch_out):
    k1, k2, k3, k4, k5, k6 = jax.random.split(key, 6)

    def conv_init(k, shape, fan_in):
        bound = float(fan_in) ** -0.5
        return jax.random.uniform(k, shape, jnp.float32, -bound, bound)

    p = {
        "w1": conv_init(k1, (ch_out, ch_in, 3), ch_in * 3),
        "b1": conv_init(k2, (ch_out,), ch_in * 3),
        "g1": jnp.ones((ch_out,), jnp.float32),
        "bt1": jnp.zeros((ch_out,), jnp.float32),
        "w2": conv_init(k3, (ch_out, ch_out, 3), ch_out * 3),
        "b2": conv_init(k4, (ch_out,), ch_out * 3),
        "g2": jnp.ones((ch_out,), jnp.float32),
        "bt2": jnp.zeros((ch_out,), jnp.float32),
    }
    if ch_out != ch_in:
        p["we"] = conv_init(k5, (ch_out, ch_in, 1), ch_in)
        p["be"] = conv_init(k6, (ch_out,), ch_in)
        p["ge"] = jnp.ones((ch_out,), jnp.float32)
        p["bte"] = jnp.zeros((ch_out,), jnp.float32)
    return p


def _conv1d_ref(x, w, b, stride, padding):
    out = jax.lax.conv_general_dilated(
        x, w, window_strides=(stride,), padding=[(padding, padding)],
        dimension_numbers=("NCH", "OIH", "NCH"))
    return out + b[None, :, None]


def _bn_train_ref(y, gamma, beta, eps=1e-5):
    mean = jnp.mean(y, axis=(0, 2), keepdims=True)
    var = jnp.mean((y - mean) ** 2, axis=(0, 2), keepdims=True)
    return (y - mean) * jax.lax.rsqrt(var + eps) * gamma[None, :, None] + beta[None, :, None]


def resblk_reference(x, params, *, stride=1):
    y = _conv1d_ref(x, params["w1"], params["b1"], stride, 1)
    y = jax.nn.relu(_bn_train_ref(y, params["g1"], params["bt1"]))
    y = _conv1d_ref(y, params["w2"], params["b2"], 1, 1)
    y = _bn_train_ref(y, params["g2"], params["bt2"])
    if "we" in params:
        s = _conv1d_ref(x, params["we"], params["be"], stride, 0)
        s = _bn_train_ref(s, params["ge"], params["bte"])
    else:
        s = x
    return jax.nn.relu(s + y)


# ----------------------------------------------------------------------------
if __name__ == "__main__":
    key = jax.random.PRNGKey(0)
    configs = [
        dict(B=2, ch_in=4, ch_out=8, L=16, stride=2),   # projection shortcut
        dict(B=2, ch_in=8, ch_out=8, L=16, stride=1),   # identity shortcut
    ]
    for cfg in configs:
        key, kx, kp = jax.random.split(key, 3)
        x = jax.random.normal(kx, (cfg["B"], cfg["ch_in"], cfg["L"]), jnp.float32)
        params = init_resblk_params(kp, cfg["ch_in"], cfg["ch_out"])

        out = jax.block_until_ready(resblk_forward(x, params, stride=cfg["stride"]))
        ref = jax.block_until_ready(resblk_reference(x, params, stride=cfg["stride"]))

        L_out = (cfg["L"] - 1) // cfg["stride"] + 1
        assert out.shape == (cfg["B"], cfg["ch_out"], L_out), out.shape
        assert bool(jnp.all(jnp.isfinite(out)))
        assert bool(jnp.all(out >= 0.0))                    # final ReLU
        err = float(jnp.max(jnp.abs(out - ref)))
        assert err < 1e-1, f"max abs err {err}"             # bf16 MXU operands, f32 accumulation
    print("KERNEL_OK")
</pallas_src>

<mosaic_0001>
module attributes {stable_mosaic.version = 11 : i64} {
  func.func @_resblk_kernel(%arg0: i32, %arg1: memref<4x128xf32, #tpu.memory_space<vmem>>, %arg2: memref<2x4x128xbf16, #tpu.memory_space<vmem>>, %arg3: memref<3x8x4xbf16, #tpu.memory_space<vmem>>, %arg4: memref<3x8x8xbf16, #tpu.memory_space<vmem>>, %arg5: memref<8x4xbf16, #tpu.memory_space<vmem>>, %arg6: memref<9x8x1xf32, #tpu.memory_space<vmem>>, %arg7: memref<8x128xf32, #tpu.memory_space<vmem>>) attributes {dimension_semantics = [#tpu.dimension_semantics<arbitrary>], iteration_bounds = array<i64: 1>, scalar_prefetch = 0 : i64, scratch_operands = 0 : i64, tpu.core_type = #tpu.core_type<tc>, window_params = [{pipeline_mode = #tpu.pipeline_mode<synchronous>, transform_indices = @transform_0, window_bounds = array<i64: 4, 128>}, {pipeline_mode = #tpu.pipeline_mode<synchronous>, transform_indices = @transform_1, window_bounds = array<i64: 2, 4, 128>}, {pipeline_mode = #tpu.pipeline_mode<synchronous>, transform_indices = @transform_2, window_bounds = array<i64: 3, 8, 4>}, {pipeline_mode = #tpu.pipeline_mode<synchronous>, transform_indices = @transform_3, window_bounds = array<i64: 3, 8, 8>}, {pipeline_mode = #tpu.pipeline_mode<synchronous>, transform_indices = @transform_4, window_bounds = array<i64: 8, 4>}, {pipeline_mode = #tpu.pipeline_mode<synchronous>, transform_indices = @transform_5, window_bounds = array<i64: 9, 8, 1>}, {pipeline_mode = #tpu.pipeline_mode<synchronous>, transform_indices = @transform_6, window_bounds = array<i64: 8, 128>}]} {
    %0 = tpu.iota {dimensions = array<i32: 1>} : vector<1x128xi32>
    %c8_i32 = arith.constant 8 : i32
    %c0_i32 = arith.constant 0 : i32
    %1 = arith.cmpi eq, %c8_i32, %c0_i32 : i32
    %c1_i32 = arith.constant 1 : i32
    %2 = arith.select %1, %c1_i32, %c8_i32 : i32
    %3 = vector.broadcast %2 : i32 to vector<1x128xi32>
    %4 = arith.remsi %0, %3 : vector<1x128xi32>
    %c0_i32_0 = arith.constant 0 : i32
    %5 = vector.broadcast %c0_i32_0 : i32 to vector<1x128xi32>
    %6 = arith.cmpi ne, %4, %5 : vector<1x128xi32>
    %c0_i32_1 = arith.constant 0 : i32
    %7 = vector.broadcast %c0_i32_1 : i32 to vector<1x128xi32>
    %8 = arith.cmpi slt, %4, %7 : vector<1x128xi32>
    %c0_i32_2 = arith.constant 0 : i32
    %9 = arith.cmpi slt, %2, %c0_i32_2 : i32
    %10 = vector.broadcast %9 : i1 to vector<1x128xi1>
    %11 = vector.broadcast %10 : vector<1x128xi1> to vector<1x128xi1>
    %12 = arith.xori %8, %11 : vector<1x128xi1>
    %13 = arith.andi %12, %6 : vector<1x128xi1>
    %14 = vector.broadcast %2 : i32 to vector<1x128xi32>
    %15 = arith.addi %4, %14 : vector<1x128xi32>
    %16 = arith.select %13, %15, %4 : vector<1x128xi1>, vector<1x128xi32>
    %c16_i32 = arith.constant 16 : i32
    %17 = vector.broadcast %c16_i32 : i32 to vector<1x128xi32>
    %18 = arith.cmpi slt, %0, %17 : vector<1x128xi32>
    %cst = arith.constant 1.000000e+00 : f32
    %cst_3 = arith.constant 0.000000e+00 : f32
    %19 = vector.broadcast %cst : f32 to vector<1x128xf32>
    %20 = vector.broadcast %cst_3 : f32 to vector<1x128xf32>
    %21 = arith.select %18, %19, %20 : vector<1x128xi1>, vector<1x128xf32>
    %c0_i32_4 = arith.constant 0 : i32
    %22 = vector.broadcast %c0_i32_4 : i32 to vector<1x128xi32>
    %23 = arith.cmpi sgt, %16, %22 : vector<1x128xi32>
    %24 = arith.andi %18, %23 : vector<1x128xi1>
    %c7_i32 = arith.constant 7 : i32
    %25 = vector.broadcast %c7_i32 : i32 to vector<1x128xi32>
    %26 = arith.cmpi slt, %16, %25 : vector<1x128xi32>
    %27 = arith.andi %18, %26 : vector<1x128xi1>
    %c0 = arith.constant 0 : index
    %c0_5 = arith.constant 0 : index
    %28 = vector.load %arg1[%c0, %c0_5] : memref<4x128xf32, #tpu.memory_space<vmem>>, vector<4x128xf32>
    %29 = arith.truncf %28 : vector<4x128xf32> to vector<4x128xbf16>
    %c0_6 = arith.constant 0 : index
    %c0_7 = arith.constant 0 : index
    %c0_8 = arith.constant 0 : index
    %30 = vector.load %arg2[%c0_6, %c0_7, %c0_8] : memref<2x4x128xbf16, #tpu.memory_space<vmem>>, vector<1x4x128xbf16>
    %31 = vector.shape_cast %30 : vector<1x4x128xbf16> to vector<4x128xbf16>
    %c1 = arith.constant 1 : index
    %c0_9 = arith.constant 0 : index
    %c0_10 = arith.constant 0 : index
    %32 = vector.load %arg2[%c1, %c0_9, %c0_10] : memref<2x4x128xbf16, #tpu.memory_space<vmem>>, vector<1x4x128xbf16>
    %33 = vector.shape_cast %32 : vector<1x4x128xbf16> to vector<4x128xbf16>
    %c0_11 = arith.constant 0 : index
    %c0_12 = arith.constant 0 : index
    %c0_13 = arith.constant 0 : index
    %34 = vector.load %arg3[%c0_11, %c0_12, %c0_13] : memref<3x8x4xbf16, #tpu.memory_space<vmem>>, vector<1x8x4xbf16>
    %35 = vector.shape_cast %34 : vector<1x8x4xbf16> to vector<8x4xbf16>
    %cst_14 = arith.constant dense<0.000000e+00> : vector<8x128xf32>
    %36 = tpu.matmul %35, %31, %cst_14 {dimension_numbers = #tpu.dot_dimension_numbers<[1], [0], [0], [1], [0, 0, 1, 1], [], []>} : vector<8x4xbf16>, vector<4x128xbf16>, vector<8x128xf32> -> vector<8x128xf32>
    %c1_15 = arith.constant 1 : index
    %c0_16 = arith.constant 0 : index
    %c0_17 = arith.constant 0 : index
    %37 = vector.load %arg3[%c1_15, %c0_16, %c0_17] : memref<3x8x4xbf16, #tpu.memory_space<vmem>>, vector<1x8x4xbf16>
    %38 = vector.shape_cast %37 : vector<1x8x4xbf16> to vector<8x4xbf16>
    %cst_18 = arith.constant dense<0.000000e+00> : vector<8x128xf32>
    %39 = tpu.matmul %38, %29, %cst_18 {dimension_numbers = #tpu.dot_dimension_numbers<[1], [0], [0], [1], [0, 0, 1, 1], [], []>} : vector<8x4xbf16>, vector<4x128xbf16>, vector<8x128xf32> -> vector<8x128xf32>
    %40 = arith.addf %36, %39 : vector<8x128xf32>
    %c2 = arith.constant 2 : index
    %c0_19 = arith.constant 0 : index
    %c0_20 = arith.constant 0 : index
    %41 = vector.load %arg3[%c2, %c0_19, %c0_20] : memref<3x8x4xbf16, #tpu.memory_space<vmem>>, vector<1x8x4xbf16>
    %42 = vector.shape_cast %41 : vector<1x8x4xbf16> to vector<8x4xbf16>
    %cst_21 = arith.constant dense<0.000000e+00> : vector<8x128xf32>
    %43 = tpu.matmul %42, %33, %cst_21 {dimension_numbers = #tpu.dot_dimension_numbers<[1], [0], [0], [1], [0, 0, 1, 1], [], []>} : vector<8x4xbf16>, vector<4x128xbf16>, vector<8x128xf32> -> vector<8x128xf32>
    %44 = arith.addf %40, %43 : vector<8x128xf32>
    %c0_22 = arith.constant 0 : index
    %c0_23 = arith.constant 0 : index
    %c0_24 = arith.constant 0 : index
    %45 = vector.load %arg6[%c0_22, %c0_23, %c0_24] : memref<9x8x1xf32, #tpu.memory_space<vmem>>, vector<1x8x1xf32>
    %46 = vector.shape_cast %45 : vector<1x8x1xf32> to vector<8x1xf32>
    %47 = vector.broadcast %46 : vector<8x1xf32> to vector<8x128xf32>
    %48 = arith.addf %44, %47 : vector<8x128xf32>
    %c1_25 = arith.constant 1 : index
    %c0_26 = arith.constant 0 : index
    %c0_27 = arith.constant 0 : index
    %49 = vector.load %arg6[%c1_25, %c0_26, %c0_27] : memref<9x8x1xf32, #tpu.memory_space<vmem>>, vector<1x8x1xf32>
    %50 = vector.shape_cast %49 : vector<1x8x1xf32> to vector<8x1xf32>
    %c2_28 = arith.constant 2 : index
    %c0_29 = arith.constant 0 : index
    %c0_30 = arith.constant 0 : index
    %51 = vector.load %arg6[%c2_28, %c0_29, %c0_30] : memref<9x8x1xf32, #tpu.memory_space<vmem>>, vector<1x8x1xf32>
    %52 = vector.shape_cast %51 : vector<1x8x1xf32> to vector<8x1xf32>
    %53 = vector.broadcast %21 : vector<1x128xf32> to vector<8x128xf32>
    %54 = arith.mulf %48, %53 : vector<8x128xf32>
    %cst_31 = arith.constant dense<0.000000e+00> : vector<8xf32>
    %55 = vector.multi_reduction <add>, %54, %cst_31 [1] : vector<8x128xf32> to vector<8xf32>
    %56 = vector.shape_cast %55 : vector<8xf32> to vector<8x1xf32>
    %cst_32 = arith.constant 6.250000e-02 : f32
    %57 = vector.broadcast %cst_32 : f32 to vector<8x1xf32>
    %58 = arith.mulf %56, %57 : vector<8x1xf32>
    %59 = vector.broadcast %58 : vector<8x1xf32> to vector<8x128xf32>
    %60 = arith.subf %48, %59 : vector<8x128xf32>
    %61 = vector.broadcast %21 : vector<1x128xf32> to vector<8x128xf32>
    %62 = arith.mulf %60, %61 : vector<8x128xf32>
    %63 = arith.mulf %62, %62 : vector<8x128xf32>
    %cst_33 = arith.constant dense<0.000000e+00> : vector<8xf32>
    %64 = vector.multi_reduction <add>, %63, %cst_33 [1] : vector<8x128xf32> to vector<8xf32>
    %65 = vector.shape_cast %64 : vector<8xf32> to vector<8x1xf32>
    %cst_34 = arith.constant 6.250000e-02 : f32
    %66 = vector.broadcast %cst_34 : f32 to vector<8x1xf32>
    %67 = arith.mulf %65, %66 : vector<8x1xf32>
    %68 = vector.broadcast %58 : vector<8x1xf32> to vector<8x128xf32>
    %69 = arith.subf %48, %68 : vector<8x128xf32>
    %cst_35 = arith.constant 9.99999974E-6 : f32
    %70 = vector.broadcast %cst_35 : f32 to vector<8x1xf32>
    %71 = arith.addf %67, %70 : vector<8x1xf32>
    %72 = math.rsqrt %71 : vector<8x1xf32>
    %73 = arith.mulf %50, %72 : vector<8x1xf32>
    %74 = vector.broadcast %73 : vector<8x1xf32> to vector<8x128xf32>
    %75 = arith.mulf %69, %74 : vector<8x128xf32>
    %76 = vector.broadcast %52 : vector<8x1xf32> to vector<8x128xf32>
    %77 = arith.addf %75, %76 : vector<8x128xf32>
    %cst_36 = arith.constant 0.000000e+00 : f32
    %78 = vector.broadcast %cst_36 : f32 to vector<8x128xf32>
    %79 = arith.maximumf %77, %78 : vector<8x128xf32>
    %c1_i32_37 = arith.constant 1 : i32
    %80 = tpu.dynamic_rotate %79 by %c1_i32_37 dim 1 : vector<8x128xf32>, i32 -> vector<8x128xf32>
    %cst_38 = arith.constant 0.000000e+00 : f32
    %81 = vector.shape_cast %24 : vector<1x128xi1> to vector<1x128xi1>
    %82 = vector.broadcast %81 : vector<1x128xi1> to vector<8x128xi1>
    %83 = vector.broadcast %cst_38 : f32 to vector<8x128xf32>
    %84 = arith.select %82, %80, %83 : vector<8x128xi1>, vector<8x128xf32>
    %85 = arith.truncf %84 : vector<8x128xf32> to vector<8x128xbf16>
    %86 = arith.truncf %79 : vector<8x128xf32> to vector<8x128xbf16>
    %c127_i32 = arith.constant 127 : i32
    %87 = tpu.dynamic_rotate %79 by %c127_i32 dim 1 : vector<8x128xf32>, i32 -> vector<8x128xf32>
    %cst_39 = arith.constant 0.000000e+00 : f32
    %88 = vector.shape_cast %27 : vector<1x128xi1> to vector<1x128xi1>
    %89 = vector.broadcast %88 : vector<1x128xi1> to vector<8x128xi1>
    %90 = vector.broadcast %cst_39 : f32 to vector<8x128xf32>
    %91 = arith.select %89, %87, %90 : vector<8x128xi1>, vector<8x128xf32>
    %92 = arith.truncf %91 : vector<8x128xf32> to vector<8x128xbf16>
    %c0_40 = arith.constant 0 : index
    %c0_41 = arith.constant 0 : index
    %c0_42 = arith.constant 0 : index
    %93 = vector.load %arg4[%c0_40, %c0_41, %c0_42] : memref<3x8x8xbf16, #tpu.memory_space<vmem>>, vector<1x8x8xbf16>
    %94 = vector.shape_cast %93 : vector<1x8x8xbf16> to vector<8x8xbf16>
    %cst_43 = arith.constant dense<0.000000e+00> : vector<8x128xf32>
    %95 = tpu.matmul %94, %85, %cst_43 {dimension_numbers = #tpu.dot_dimension_numbers<[1], [0], [0], [1], [0, 0, 1, 1], [], []>} : vector<8x8xbf16>, vector<8x128xbf16>, vector<8x128xf32> -> vector<8x128xf32>
    %c1_44 = arith.constant 1 : index
    %c0_45 = arith.constant 0 : index
    %c0_46 = arith.constant 0 : index
    %96 = vector.load %arg4[%c1_44, %c0_45, %c0_46] : memref<3x8x8xbf16, #tpu.memory_space<vmem>>, vector<1x8x8xbf16>
    %97 = vector.shape_cast %96 : vector<1x8x8xbf16> to vector<8x8xbf16>
    %cst_47 = arith.constant dense<0.000000e+00> : vector<8x128xf32>
    %98 = tpu.matmul %97, %86, %cst_47 {dimension_numbers = #tpu.dot_dimension_numbers<[1], [0], [0], [1], [0, 0, 1, 1], [], []>} : vector<8x8xbf16>, vector<8x128xbf16>, vector<8x128xf32> -> vector<8x128xf32>
    %99 = arith.addf %95, %98 : vector<8x128xf32>
    %c2_48 = arith.constant 2 : index
    %c0_49 = arith.constant 0 : index
    %c0_50 = arith.constant 0 : index
    %100 = vector.load %arg4[%c2_48, %c0_49, %c0_50] : memref<3x8x8xbf16, #tpu.memory_space<vmem>>, vector<1x8x8xbf16>
    %101 = vector.shape_cast %100 : vector<1x8x8xbf16> to vector<8x8xbf16>
    %cst_51 = arith.constant dense<0.000000e+00> : vector<8x128xf32>
    %102 = tpu.matmul %101, %92, %cst_51 {dimension_numbers = #tpu.dot_dimension_numbers<[1], [0], [0], [1], [0, 0, 1, 1], [], []>} : vector<8x8xbf16>, vector<8x128xbf16>, vector<8x128xf32> -> vector<8x128xf32>
    %103 = arith.addf %99, %102 : vector<8x128xf32>
    %c3 = arith.constant 3 : index
    %c0_52 = arith.constant 0 : index
    %c0_53 = arith.constant 0 : index
    %104 = vector.load %arg6[%c3, %c0_52, %c0_53] : memref<9x8x1xf32, #tpu.memory_space<vmem>>, vector<1x8x1xf32>
    %105 = vector.shape_cast %104 : vector<1x8x1xf32> to vector<8x1xf32>
    %106 = vector.broadcast %105 : vector<8x1xf32> to vector<8x128xf32>
    %107 = arith.addf %103, %106 : vector<8x128xf32>
    %c4 = arith.constant 4 : index
    %c0_54 = arith.constant 0 : index
    %c0_55 = arith.constant 0 : index
    %108 = vector.load %arg6[%c4, %c0_54, %c0_55] : memref<9x8x1xf32, #tpu.memory_space<vmem>>, vector<1x8x1xf32>
    %109 = vector.shape_cast %108 : vector<1x8x1xf32> to vector<8x1xf32>
    %c5 = arith.constant 5 : index
    %c0_56 = arith.constant 0 : index
    %c0_57 = arith.constant 0 : index
    %110 = vector.load %arg6[%c5, %c0_56, %c0_57] : memref<9x8x1xf32, #tpu.memory_space<vmem>>, vector<1x8x1xf32>
    %111 = vector.shape_cast %110 : vector<1x8x1xf32> to vector<8x1xf32>
    %112 = vector.broadcast %21 : vector<1x128xf32> to vector<8x128xf32>
    %113 = arith.mulf %107, %112 : vector<8x128xf32>
    %cst_58 = arith.constant dense<0.000000e+00> : vector<8xf32>
    %114 = vector.multi_reduction <add>, %113, %cst_58 [1] : vector<8x128xf32> to vector<8xf32>
    %115 = vector.shape_cast %114 : vector<8xf32> to vector<8x1xf32>
    %cst_59 = arith.constant 6.250000e-02 : f32
    %116 = vector.broadcast %cst_59 : f32 to vector<8x1xf32>
    %117 = arith.mulf %115, %116 : vector<8x1xf32>
    %118 = vector.broadcast %117 : vector<8x1xf32> to vector<8x128xf32>
    %119 = arith.subf %107, %118 : vector<8x128xf32>
    %120 = vector.broadcast %21 : vector<1x128xf32> to vector<8x128xf32>
    %121 = arith.mulf %119, %120 : vector<8x128xf32>
    %122 = arith.mulf %121, %121 : vector<8x128xf32>
    %cst_60 = arith.constant dense<0.000000e+00> : vector<8xf32>
    %123 = vector.multi_reduction <add>, %122, %cst_60 [1] : vector<8x128xf32> to vector<8xf32>
    %124 = vector.shape_cast %123 : vector<8xf32> to vector<8x1xf32>
    %cst_61 = arith.constant 6.250000e-02 : f32
    %125 = vector.broadcast %cst_61 : f32 to vector<8x1xf32>
    %126 = arith.mulf %124, %125 : vector<8x1xf32>
    %127 = vector.broadcast %117 : vector<8x1xf32> to vector<8x128xf32>
    %128 = arith.subf %107, %127 : vector<8x128xf32>
    %cst_62 = arith.constant 9.99999974E-6 : f32
    %129 = vector.broadcast %cst_62 : f32 to vector<8x1xf32>
    %130 = arith.addf %126, %129 : vector<8x1xf32>
    %131 = math.rsqrt %130 : vector<8x1xf32>
    %132 = arith.mulf %109, %131 : vector<8x1xf32>
    %133 = vector.broadcast %132 : vector<8x1xf32> to vector<8x128xf32>
    %134 = arith.mulf %128, %133 : vector<8x128xf32>
    %135 = vector.broadcast %111 : vector<8x1xf32> to vector<8x128xf32>
    %136 = arith.addf %134, %135 : vector<8x128xf32>
    %c0_63 = arith.constant 0 : index
    %c0_64 = arith.constant 0 : index
    %137 = vector.load %arg5[%c0_63, %c0_64] : memref<8x4xbf16, #tpu.memory_space<vmem>>, vector<8x4xbf16>
    %cst_65 = arith.constant dense<0.000000e+00> : vector<8x128xf32>
    %138 = tpu.matmul %137, %29, %cst_65 {dimension_numbers = #tpu.dot_dimension_numbers<[1], [0], [0], [1], [0, 0, 1, 1], [], []>} : vector<8x4xbf16>, vector<4x128xbf16>, vector<8x128xf32> -> vector<8x128xf32>
    %c6 = arith.constant 6 : index
    %c0_66 = arith.constant 0 : index
    %c0_67 = arith.constant 0 : index
    %139 = vector.load %arg6[%c6, %c0_66, %c0_67] : memref<9x8x1xf32, #tpu.memory_space<vmem>>, vector<1x8x1xf32>
    %140 = vector.shape_cast %139 : vector<1x8x1xf32> to vector<8x1xf32>
    %141 = vector.broadcast %140 : vector<8x1xf32> to vector<8x128xf32>
    %142 = arith.addf %138, %141 : vector<8x128xf32>
    %c7 = arith.constant 7 : index
    %c0_68 = arith.constant 0 : index
    %c0_69 = arith.constant 0 : index
    %143 = vector.load %arg6[%c7, %c0_68, %c0_69] : memref<9x8x1xf32, #tpu.memory_space<vmem>>, vector<1x8x1xf32>
    %144 = vector.shape_cast %143 : vector<1x8x1xf32> to vector<8x1xf32>
    %c8 = arith.constant 8 : index
    %c0_70 = arith.constant 0 : index
    %c0_71 = arith.constant 0 : index
    %145 = vector.load %arg6[%c8, %c0_70, %c0_71] : memref<9x8x1xf32, #tpu.memory_space<vmem>>, vector<1x8x1xf32>
    %146 = vector.shape_cast %145 : vector<1x8x1xf32> to vector<8x1xf32>
    %147 = vector.broadcast %21 : vector<1x128xf32> to vector<8x128xf32>
    %148 = arith.mulf %142, %147 : vector<8x128xf32>
    %cst_72 = arith.constant dense<0.000000e+00> : vector<8xf32>
    %149 = vector.multi_reduction <add>, %148, %cst_72 [1] : vector<8x128xf32> to vector<8xf32>
    %150 = vector.shape_cast %149 : vector<8xf32> to vector<8x1xf32>
    %cst_73 = arith.constant 6.250000e-02 : f32
    %151 = vector.broadcast %cst_73 : f32 to vector<8x1xf32>
    %152 = arith.mulf %150, %151 : vector<8x1xf32>
    %153 = vector.broadcast %152 : vector<8x1xf32> to vector<8x128xf32>
    %154 = arith.subf %142, %153 : vector<8x128xf32>
    %155 = vector.broadcast %21 : vector<1x128xf32> to vector<8x128xf32>
    %156 = arith.mulf %154, %155 : vector<8x128xf32>
    %157 = arith.mulf %156, %156 : vector<8x128xf32>
    %cst_74 = arith.constant dense<0.000000e+00> : vector<8xf32>
    %158 = vector.multi_reduction <add>, %157, %cst_74 [1] : vector<8x128xf32> to vector<8xf32>
    %159 = vector.shape_cast %158 : vector<8xf32> to vector<8x1xf32>
    %cst_75 = arith.constant 6.250000e-02 : f32
    %160 = vector.broadcast %cst_75 : f32 to vector<8x1xf32>
    %161 = arith.mulf %159, %160 : vector<8x1xf32>
    %162 = vector.broadcast %152 : vector<8x1xf32> to vector<8x128xf32>
    %163 = arith.subf %142, %162 : vector<8x128xf32>
    %cst_76 = arith.constant 9.99999974E-6 : f32
    %164 = vector.broadcast %cst_76 : f32 to vector<8x1xf32>
    %165 = arith.addf %161, %164 : vector<8x1xf32>
    %166 = math.rsqrt %165 : vector<8x1xf32>
    %167 = arith.mulf %144, %166 : vector<8x1xf32>
    %168 = vector.broadcast %167 : vector<8x1xf32> to vector<8x128xf32>
    %169 = arith.mulf %163, %168 : vector<8x128xf32>
    %170 = vector.broadcast %146 : vector<8x1xf32> to vector<8x128xf32>
    %171 = arith.addf %169, %170 : vector<8x128xf32>
    %172 = arith.addf %171, %136 : vector<8x128xf32>
    %cst_77 = arith.constant 0.000000e+00 : f32
    %173 = vector.broadcast %cst_77 : f32 to vector<8x128xf32>
    %174 = arith.maximumf %172, %173 : vector<8x128xf32>
    %c0_78 = arith.constant 0 : index
    %c0_79 = arith.constant 0 : index
    %175 = vector.load %arg7[%c0_78, %c0_79] : memref<8x128xf32, #tpu.memory_space<vmem>>, vector<8x128xf32>
    tpu.vector_store %arg7[%c0_78, %c0_79], %174 {strides = array<i32>} : memref<8x128xf32, #tpu.memory_space<vmem>>, vector<8x128xf32>,
    return
  }
  func.func @transform_0(%arg0: i32) -> (i32, i32) {
    %c0_i32 = arith.constant 0 : i32
    %c0_i32_0 = arith.constant 0 : i32
    %c0_i32_1 = arith.constant 0 : i32
    return %c0_i32, %c0_i32_0 : i32, i32
  }
  func.func @transform_1(%arg0: i32) -> (i32, i32, i32) {
    %c0_i32 = arith.constant 0 : i32
    %c0_i32_0 = arith.constant 0 : i32
    %c0_i32_1 = arith.constant 0 : i32
    %c0_i32_2 = arith.constant 0 : i32
    return %c0_i32, %c0_i32_0, %c0_i32_1 : i32, i32, i32
  }
  func.func @transform_2(%arg0: i32) -> (i32, i32, i32) {
    %c0_i32 = arith.constant 0 : i32
    %c0_i32_0 = arith.constant 0 : i32
    %c0_i32_1 = arith.constant 0 : i32
    %c0_i32_2 = arith.constant 0 : i32
    return %c0_i32, %c0_i32_0, %c0_i32_1 : i32, i32, i32
  }
  func.func @transform_3(%arg0: i32) -> (i32, i32, i32) {
    %c0_i32 = arith.constant 0 : i32
    %c0_i32_0 = arith.constant 0 : i32
    %c0_i32_1 = arith.constant 0 : i32
    %c0_i32_2 = arith.constant 0 : i32
    return %c0_i32, %c0_i32_0, %c0_i32_1 : i32, i32, i32
  }
  func.func @transform_4(%arg0: i32) -> (i32, i32) {
    %c0_i32 = arith.constant 0 : i32
    %c0_i32_0 = arith.constant 0 : i32
    %c0_i32_1 = arith.constant 0 : i32
    return %c0_i32, %c0_i32_0 : i32, i32
  }
  func.func @transform_5(%arg0: i32) -> (i32, i32, i32) {
    %c0_i32 = arith.constant 0 : i32
    %c0_i32_0 = arith.constant 0 : i32
    %c0_i32_1 = arith.constant 0 : i32
    %c0_i32_2 = arith.constant 0 : i32
    return %c0_i32, %c0_i32_0, %c0_i32_1 : i32, i32, i32
  }
  func.func @transform_6(%arg0: i32) -> (i32, i32) {
    %c0_i32 = arith.constant 0 : i32
    %c0_i32_0 = arith.constant 0 : i32
    %c0_i32_1 = arith.constant 0 : i32
    return %c0_i32, %c0_i32_0 : i32, i32
  }
}

</mosaic_0001>

<bundles_post_ra>
// kernel: tpu_custom_call.1
= control target key start
LH: loop header
LB: loop body
LE: loop exit
PB: predicated region body
PF: predicated region fallthrough
CT: control target
= control target key end

     0   :  { %vm57_vm0 = vcmask 1041408   ;;  %v640_v2 = vmov 0.0   ;;  %vm641_vm1 = vmmov 0   ;;  %vm53_vm2 = vcmask 31744   ;;  %s800_s0 = inlined_call_operand.vmem [shape: f32[4,128], index: 0, kind: input, shape index: {}]   ;;  %s801_s1 = inlined_call_operand.vmem [shape: bf16[2,4,128], index: 1, kind: input, shape index: {}]   ;;  %s802_s2 = inlined_call_operand.vmem [shape: bf16[3,8,4], index: 2, kind: input, shape index: {}]   ;;  %s803_s3 = inlined_call_operand.vmem [shape: bf16[3,8,8], index: 3, kind: input, shape index: {}]   ;;  %s804_s4 = inlined_call_operand.vmem [shape: bf16[8,4], index: 4, kind: input, shape index: {}]   ;;  %s805_s5 = inlined_call_operand.vmem [shape: f32[9,8,1], index: 5, kind: input, shape index: {}]   ;;  %s806_s6 = inlined_call_operand.hbm [shape: f32[8,128], index: 6, kind: output, shape index: {}]  }
   0x1   :  { %v45_v0 = vld [vmem:[%s800_s0] sm:$0xf]  ;;  %560 = vmatprep.subr.bf16.mxu0 %v640_v2  ;;  %566 = vmatprep.subr.bf16.mxu1 %v640_v2 }
   0x2   :  { %v47_v1 = vld [vmem:[%s801_s1] sm:$0x3]  ;;  %v46_v3 = vpack.c.bf16 %v45_v0, %v45_v0  ;;  %562 = vmatprep.mubr.msk.bf16.mxu0 %vm641_vm1, %v640_v2  ;;  %v526_v6 = vld [vmem:[%s801_s1 + $0x2] sm:$0x3]  ;;  %568 = vmatprep.mubr.msk.bf16.mxu1 %vm641_vm1, %v640_v2 }
   0x3   :  { %v105_v4 = vsel %vm57_vm0, %v47_v1, 0  ;;  %v50_v5 = vld [vmem:[%s802_s2] sm:$0xf] }
   0x4   :  { %567 = vmatpush3.bf16.msra.mxu1 %v105_v4  ;;  %v699_v7 = vsel %vm57_vm0, %v46_v3, 0  ;;  %v196_v8 = vld [vmem:[%s805_s5] sm:$0xff] }
   0x5   :  { %578 = vmatprep.subr.bf16.mxu1 %v640_v2 }
   0x6   :  { %11 = vsyncpa [#allocation3], 0  ;;  %561 = vmatpush3.bf16.msra.mxu0 %v699_v7  ;;  %v527_v9 = vld [vmem:[%s802_s2 + $0x4] sm:$0xf]  ;;  %v642_v10 = vmov 0   ;;  %v153_v11 = vsel %vm57_vm0, %v526_v6, 0  ;;  %v25_v15 = vlaneseq }
   0x7   :  { %608 = vset.pattern.permute.xlu0 %v642_v10  ;;  %569 = vmatmul.mubr.msk.bf16.vlgmr.msra.gmra.mrb[0].mxu1 %vm53_vm2, %v50_v5  ;;  %v530_v12 = vld [vmem:[%s802_s2 + $0x8] sm:$0xf]  ;;  %v542_v33 = vld [vmem:[%s805_s5 + $0x30] sm:$0xff]  ;;  %vm253_vm4 = vcmask 1043456   ;;  %s643_s14 = smov 1   ;;  %vm249_vm5 = vcmask 64512  }
   0x8   :  { %572 = vmatprep.subr.bf16.mxu0 %v640_v2  ;;  %199 = vperm.xlu0 %608, %v196_v8   ;;  %v26_v23 = vand.u32 127, %v25_v15  ;;  %v532_v42 = vld [vmem:[%s805_s5 + $0x8] sm:$0xff]  ;;  %v533_v45 = vld [vmem:[%s805_s5 + $0x10] sm:$0xff]  ;;  %v534_v53 = vld [vmem:[%s803_s3 + $0x4] sm:$0xf]  ;;  %s644_s17 = smov 127  }
   0x9   :  { %609 = vset.pattern.permute.xlu1 %v642_v10  ;;  %563 = vmatmul.mubr.msk.bf16.vlgmr.msra.gmra.mrb[0].mxu0 %vm53_vm2, %v527_v9  ;;  %v539_v54 = vld [vmem:[%s805_s5 + $0x18] sm:$0xff]  ;;  %v246_v62 = vld [vmem:[%s803_s3] sm:$0xf]  ;;  %v537_v1 = vld [vmem:[%s803_s3 + $0x8] sm:$0xf]  ;;  %s645_s7 = smov [#allocation2]  }
   0xa   :  { %580 = vmatprep.mubr.msk.bf16.mxu1 %vm641_vm1, %v640_v2  ;;  %573 = vmatpush3.bf16.msra.mxu0 %v153_v11  ;;  %vm39_vm3 = vcmp.lt.s32.totalorder %v26_v23, 16  ;;  %v31_v55 = vand.u32 7, %v26_v23  ;;  %v429_v3 = vld [vmem:[%s804_s4] sm:$0xf]  ;;  %s518_s1 = sshll.u32 %s645_s7, 4  ;;  %s519_s1 = int_to_ptr.vmem [resolvable:$true] %s518_s1 }
   0xb   :  { %574 = vmatprep.mubr.msk.bf16.mxu0 %vm641_vm1, %v640_v2  ;;  %584 = vmatprep.subr.bf16.mxu0 %v640_v2  ;;  %v728_v29 = vsel %vm39_vm3, 1.0, %v640_v2  ;;  %s616_s8 = scalar_lea.vmem %s519_s1, 128  ;;  %p621_p1 = scmp.lt.s32.totalorder %s519_s1, %s519_s1 }
   0xc   :  { %vm41_vm6 = vcmp.gt.s32.totalorder %v31_v55, 0  ;;  %vm43_vm8 = vcmp.lt.s32.totalorder %v31_v55, 7  ;;  %p617_p0 = scmp.ne.s32.totalorder %s519_s1, %s616_s8  ;;  %p622_p2 = scmp.lt.s32.totalorder %s616_s8, %s616_s8 }
   0xd   :  { %vm42_vm7 = vmand %vm39_vm3, %vm41_vm6 }
   0xe   :  { %vm44_vm9 = vmand %vm39_vm3, %vm43_vm8  ;;  %p623_p3 = por %p622_p2, %p621_p1 }
  0x10   :  { %p624_p4 = pnand %p623_p3, %p617_p0 }
  0x11   :  { %575 = vmatmul.mubr.msk.bf16.vlgmr.msra.gmra.mrb[4].mxu0 %vm53_vm2, %v530_v12 }
  0x12   :  { %586 = vmatprep.mubr.msk.bf16.mxu0 %vm641_vm1, %v640_v2 }
  0x87   :  { %v200_v25 = vpop.permute.xlu0 %199 }
  0xda   :  { %v141_v13 = vpop.f32.mrb[0].mxu1 }
  0xdb   :  { %v570_v14 = vpop.f32.mrb[1].mxu1 }
  0xdc   :  { %v95_v16 = vpop.f32.mrb[0].mxu0  ;;  %v144_v17 = vpop.f32.mrb[2].mxu1 }
  0xdd   :  { %v142_v18 = vadd.f32 %v141_v13, %v95_v16  ;;  %v564_v19 = vpop.f32.mrb[1].mxu0  ;;  %v571_v20 = vpop.f32.mrb[3].mxu1 }
  0xde   :  { %v98_v21 = vpop.f32.mrb[2].mxu0 }
  0xdf   :  { %v565_v22 = vpop.f32.mrb[3].mxu0 }
  0xe4   :  { %v189_v24 = vpop.f32.mrb[4].mxu0 }
  0xe5   :  { %v195_v26 = vadd.f32 %v189_v24, %v142_v18  ;;  %v576_v27 = vpop.f32.mrb[5].mxu0 }
  0xe6   :  { %v192_v28 = vpop.f32.mrb[6].mxu0 }
  0xe7   :  { %v202_v30 = vadd.f32 %v200_v25, %v195_v26  ;;  %v577_v31 = vpop.f32.mrb[7].mxu0 }
  0xe9   :  { %v207_v32 = vmul.f32 %v202_v30, %v728_v29 }
  0xeb   :  { %208 = vadd.xlane.f32.xlu0 %v207_v32 }
 0x101   :  { %434 = vperm.xlu0 %608, %v542_v33  }
 0x178   :  { %v209_v34 = vpop.xlane.xlu0 %208 }
 0x179   :  { %v210_v35 = vmul.f32 0.0625, %v209_v34 }
 0x17b   :  { %v211_v36 = vsub.f32 %v202_v30, %v210_v35 }
 0x17d   :  { %v212_v37 = vmul.f32 %v211_v36, %v728_v29 }
 0x17f   :  { %v213_v38 = vmul.f32 %v212_v37, %v212_v37 }
 0x180   :  { %v435_v19 = vpop.permute.xlu0 %434 }
 0x181   :  { %214 = vadd.xlane.f32.xlu1 %v213_v38 }
 0x20e   :  { %v215_v39 = vpop.xlane.xlu1 %214 }
 0x20f   :  { %v216_v40 = vmul.f32 0.0625, %v215_v39 }
 0x211   :  { %v217_v41 = vadd.f32 1e-05, %v216_v40 }
 0x213   :  { %610 = vrsqrt.f32 %v217_v41 }
 0x21d   :  { %v611_v43 = vpop.eup %610 }
 0x21e   :  { %v219_v44 = vmul.f32 %v611_v43, %v532_v42 }
 0x220   :  { %222 = vperm.xlu1 %609, %v219_v44   ;;  %v540_v44 = vld [vmem:[%s805_s5 + $0x20] sm:$0xff] }
 0x224   :  { %228 = vperm.xlu1 %609, %v533_v45  }
 0x29f   :  { %v223_v46 = vpop.permute.xlu1 %222 }
 0x2a0   :  { %v225_v47 = vmul.f32 %v223_v46, %v211_v36 }
 0x2a3   :  { %v229_v48 = vpop.permute.xlu1 %228 }
 0x2a4   :  { %v231_v49 = vadd.f32 %v229_v48, %v225_v47  ;;  %v541_v48 = vld [vmem:[%s805_s5 + $0x28] sm:$0xff] }
 0x2a6   :  { %v232_v50 = vmax.f32 %v231_v49, 0.0 }
 0x2a8   :  { %233 = vrot.lane.b32.xlu1 %v232_v50, %s643_s14  ;;  %v239_v51 = vpack.c.bf16 %v232_v50, %v232_v50 }
 0x2aa   :  { %v255_v52 = vsel %vm253_vm4, %v239_v51, 0 }
 0x2ab   :  { %579 = vmatpush3.bf16.msra.mxu1 %v255_v52 }
 0x2ac   :  { %240 = vrot.lane.b32.xlu1 %v232_v50, %s644_s17  ;;  %590 = vmatprep.subr.bf16.mxu1 %v640_v2  ;;  %v545_v50 = vld [vmem:[%s805_s5 + $0x40] sm:$0xff] }
 0x2ae   :  { %581 = vmatmul.mubr.msk.bf16.vlgmr.msra.gmra.mrb[4].mxu1 %vm249_vm5, %v534_v53 }
 0x2af   :  { %592 = vmatprep.mubr.msk.bf16.mxu1 %vm641_vm1, %v640_v2 }
 0x2b0   :  { %396 = vperm.xlu1 %609, %v539_v54  }
 0x31a   :  { %v234_v56 = vpop.permute.xlu1 %233 }
 0x31b   :  { %v237_v57 = vsel %vm42_vm7, %v234_v56, 0.0 }
 0x31c   :  { %v238_v58 = vpack.c.bf16 %v237_v57, %v237_v57 }
 0x31e   :  { %v301_v59 = vsel %vm253_vm4, %v238_v58, 0  ;;  %v241_v60 = vpop.permute.xlu1 %240 }
 0x31f   :  { %v244_v61 = vsel %vm44_vm9, %v241_v60, 0.0  ;;  %585 = vmatpush3.bf16.msra.mxu0 %v301_v59 }
 0x320   :  { %v245_v63 = vpack.c.bf16 %v244_v61, %v244_v61  ;;  %596 = vmatprep.subr.bf16.mxu0 %v640_v2 }
 0x322   :  { %v349_v0 = vsel %vm253_vm4, %v245_v63, 0  ;;  %587 = vmatmul.mubr.msk.bf16.vlgmr.msra.gmra.mrb[8].mxu0 %vm249_vm5, %v246_v62 }
 0x323   :  { %591 = vmatpush3.bf16.msra.mxu1 %v349_v0  ;;  %597 = vmatpush3.bf16.msra.mxu0 %v699_v7 }
 0x324   :  { %598 = vmatprep.mubr.msk.bf16.mxu0 %vm641_vm1, %v640_v2 }
 0x326   :  { %593 = vmatmul.mubr.msk.bf16.vlgmr.msra.gmra.mrb[8].mxu1 %vm249_vm5, %v537_v1 }
 0x32a   :  { %599 = vmatmul.mubr.msk.bf16.vlgmr.msra.gmra.mrb[12].mxu0 %vm53_vm2, %v429_v3 }
 0x32f   :  { %v397_v15 = vpop.permute.xlu1 %396 }
 0x381   :  { %v291_v4 = vpop.f32.mrb[4].mxu1 }
 0x382   :  { %v582_v5 = vpop.f32.mrb[5].mxu1 }
 0x383   :  { %v294_v6 = vpop.f32.mrb[6].mxu1 }
 0x384   :  { %v583_v8 = vpop.f32.mrb[7].mxu1 }
 0x3f5   :  { %v337_v9 = vpop.f32.mrb[8].mxu0 }
 0x3f6   :  { %v338_v10 = vadd.f32 %v337_v9, %v291_v4  ;;  %v588_v11 = vpop.f32.mrb[9].mxu0 }
 0x3f7   :  { %v340_v12 = vpop.f32.mrb[10].mxu0 }
 0x3f8   :  { %v589_v7 = vpop.f32.mrb[11].mxu0 }
 0x3f9   :  { %v385_v13 = vpop.f32.mrb[8].mxu1 }
 0x3fa   :  { %v391_v14 = vadd.f32 %v385_v13, %v338_v10  ;;  %v594_v2 = vpop.f32.mrb[9].mxu1 }
 0x3fb   :  { %v388_v16 = vpop.f32.mrb[10].mxu1 }
 0x3fc   :  { %v399_v17 = vadd.f32 %v397_v15, %v391_v14  ;;  %v595_v18 = vpop.f32.mrb[11].mxu1 }
 0x3fd   :  { %v474_v20 = vpop.f32.mrb[12].mxu0 }
 0x3fe   :  { %v475_v21 = vadd.f32 %v474_v20, %v435_v19  ;;  %v404_v22 = vmul.f32 %v399_v17, %v728_v29  ;;  %v600_v23 = vpop.f32.mrb[13].mxu0 }
 0x3ff   :  { %v477_v24 = vpop.f32.mrb[14].mxu0 }
 0x400   :  { %405 = vadd.xlane.f32.xlu1 %v404_v22  ;;  %v484_v25 = vmul.f32 %v475_v21, %v728_v29  ;;  %v601_v26 = vpop.f32.mrb[15].mxu0 }
 0x402   :  { %485 = vadd.xlane.f32.xlu0 %v484_v25 }
 0x48d   :  { %v406_v27 = vpop.xlane.xlu1 %405 }
 0x48e   :  { %v407_v28 = vmul.f32 0.0625, %v406_v27 }
 0x48f   :  { %v486_v30 = vpop.xlane.xlu0 %485 }
 0x490   :  { %v408_v31 = vsub.f32 %v399_v17, %v407_v28  ;;  %v487_v32 = vmul.f32 0.0625, %v486_v30 }
 0x492   :  { %v488_v33 = vsub.f32 %v475_v21, %v487_v32  ;;  %v409_v34 = vmul.f32 %v408_v31, %v728_v29 }
 0x494   :  { %v410_v35 = vmul.f32 %v409_v34, %v409_v34  ;;  %v489_v36 = vmul.f32 %v488_v33, %v728_v29  ;;  %v544_v29 = vld [vmem:[%s805_s5 + $0x38] sm:$0xff] }
 0x496   :  { %411 = vadd.xlane.f32.xlu1 %v410_v35  ;;  %v490_v37 = vmul.f32 %v489_v36, %v489_v36 }
 0x49a   :  { %491 = vadd.xlane.f32.xlu1 %v490_v37 }
 0x523   :  { %v412_v38 = vpop.xlane.xlu1 %411 }
 0x524   :  { %v413_v39 = vmul.f32 0.0625, %v412_v38 }
 0x526   :  { %v414_v40 = vadd.f32 1e-05, %v413_v39 }
 0x527   :  { %v492_v41 = vpop.xlane.xlu1 %491 }
 0x528   :  { %612 = vrsqrt.f32 %v414_v40  ;;  %v493_v42 = vmul.f32 0.0625, %v492_v41 }
 0x52a   :  { %v494_v43 = vadd.f32 1e-05, %v493_v42 }
 0x52c   :  { %614 = vrsqrt.f32 %v494_v43 }
 0x532   :  { %v613_v45 = vpop.eup %612 }
 0x533   :  { %v416_v46 = vmul.f32 %v613_v45, %v540_v44 }
 0x535   :  { %419 = vperm.xlu1 %609, %v416_v46  }
 0x536   :  { %v615_v47 = vpop.eup %614 }
 0x537   :  { %v496_v49 = vmul.f32 %v615_v47, %v544_v29 }
 0x539   :  { %425 = vperm.xlu1 %609, %v541_v48   ;;  %499 = vperm.xlu0 %608, %v496_v49  }
 0x53d   :  { %505 = vperm.xlu1 %609, %v545_v50  }
 0x5b4   :  { %v420_v51 = vpop.permute.xlu1 %419 }
 0x5b5   :  { %v422_v54 = vmul.f32 %v420_v51, %v408_v31 }
 0x5b8   :  { %v500_v52 = vpop.permute.xlu0 %499  ;;  %v426_v53 = vpop.permute.xlu1 %425 }
 0x5b9   :  { %v502_v55 = vmul.f32 %v500_v52, %v488_v33  ;;  %v428_v57 = vadd.f32 %v426_v53, %v422_v54 }
 0x5bc   :  { %v506_v56 = vpop.permute.xlu1 %505 }
 0x5bd   :  { %v508_v58 = vadd.f32 %v506_v56, %v502_v55 }
 0x5bf   :  { %v509_v59 = vadd.f32 %v508_v58, %v428_v57 }
 0x5c1   :  { %v510_v60 = vmax.f32 %v509_v59, 0.0 }
 0x5c3   :  { %511 = vst [vmem:[#allocation2] sm:$0xff] %v510_v60 }
 0x5c4   :  { %627 = shalt.err (!%p624_p4)
}
 0x5c5   :  { %s628_s9 = scalar_lea.hbm %s806_s6, 128 }
 0x5c6   :  { %p629_p5 = scmp.ne.s32.totalorder %s806_s6, %s628_s9  ;;  %p632_p6 = scmp.lt.u32.totalorder %s628_s9, %s806_s6 }
 0x5c8   :  { %p634_p7 = pnand %p632_p6, %p629_p5 }
 0x5ca   :  { %637 = shalt.err (!%p634_p7)
}
 0x5cb   :  { %521 = dma.vmem_to_hbm [thread:$0]  %s519_s1, 128, %s806_s6, [#allocation3]  }
 0x5cc   :  { %638 = dma.done.wait [#allocation3], 128  }
 0x5cd   :  { %639 = vsyncadd [#allocation3], 4294967168 }
 0x5ce   :  { %525 = vsyncpa [#allocation3], 1 }

</bundles_post_ra>
